<compile_context>
chip_gen: v5e
topology: v5e:2x2
jax: 0.10.0
libtpu: 0.0.40
codegen_flags: <defaults>
</compile_context>

<pallas_src>
import functools

import jax
import jax.numpy as jnp
from jax.experimental import pallas as pl
from jax.experimental.pallas import tpu as pltpu


# ------------------------- configuration (small, forward-consistent) --------
BATCH = 2
NNEURONS = 64          # nneurons
NBG = 20               # nbg
BG_INPUT_SIZE = 4      # bg_input_size
BG_HIDDEN = 16         # bg_layer_sizes = (16,)
CUE_SIZE = 3           # input_sources = {"cue": (3, True)}
NSTEPS = 8             # rollout length (one module forward per grid step)
DT = 0.05
TAU = 0.15
G0 = 1.2

# Feed the MXU bf16 with f32 accumulation (native on v6e/v7x, fine on v5e).
# TODO(synk): flip to False if iterated-Euler numerics require full-f32 matmuls.
MXU_BF16 = True


def _rnn_static_bg_kernel(
    # --- per-timestep inputs (block index follows the grid) ---
    bg_in_ref,   # (1, B, d_bg)
    cue_ref,     # (1, B, d_cue)
    # --- resident inputs (constant block index -> DMA'd once, stay in VMEM) ---
    x0_ref,      # (B, n)
    w1_ref,      # (d_bg, h)        MXU dtype
    b1_ref,      # (1, h)           f32
    w2_ref,      # (h, nbg)         MXU dtype
    b2_ref,      # (1, nbg)         f32
    jt_ref,      # (n, n)   = J^T   f32 (elementwise only)
    vt_ref,      # (n, nbg) = V^T   f32 (elementwise only)
    ut_ref,      # (nbg, n) = U^T   MXU dtype
    win_ref,     # (d_cue, n) = W_in^T  MXU dtype
    bin_ref,     # (1, n)           f32
    # --- outputs ---
    r_ref,       # (1, B, 2n)  packed [x_new | tanh(x_new)], lane-dense
    bg_ref,      # (1, B, nbg)
    # --- scratch ---
    x_scr,       # (B, n) f32 hidden-state carry across timesteps
    *,
    alpha,       # dt / tau (python float, baked in)
):
    f32 = jnp.float32
    batch, n = x_scr.shape
    nbg = vt_ref.shape[1]

    # Load the initial state into the carry on the first grid step only.
    @pl.when(pl.program_id(0) == 0)
    def _():
        x_scr[...] = x0_ref[...].astype(f32)

    x = x_scr[...]                                    # (B, n) f32
    r0 = jnp.tanh(x)                                  # (B, n) f32

    # ---- BG MLP: Linear -> ReLU -> Linear (bias included) ----
    bg_in = bg_in_ref[0].astype(w1_ref.dtype)         # (B, d_bg)
    h = jnp.dot(bg_in, w1_ref[...], preferred_element_type=f32) + b1_ref[...]
    h = jnp.maximum(h, 0.0)
    bg_act = (jnp.dot(h.astype(w2_ref.dtype), w2_ref[...],
                      preferred_element_type=f32) + b2_ref[...])      # (B, nbg) f32
    bg_ref[0] = bg_act.astype(bg_ref.dtype)

    # ---- external RNN input drive: u @ W_in^T + b_in ----
    drive = (jnp.dot(cue_ref[0].astype(win_ref.dtype), win_ref[...],
                     preferred_element_type=f32) + bin_ref[...])      # (B, n) f32

    # ---- per-batch recurrent weights gated by the BG gain (no python loop) ----
    #   W_eff[b]^T = J^T * ((V^T * g_b) @ U^T)
    # Stack the gated loadings over the batch into one (B*n, nbg) = (128, 20)
    # tile so the MXU sees a single (128, 20) @ (20, 64) push.
    gvt = vt_ref[...][None, :, :] * bg_act[:, None, :]            # (B, n, nbg) f32
    gvt2 = gvt.reshape(batch * n, nbg).astype(ut_ref.dtype)       # (B*n, nbg)
    m = jnp.dot(gvt2, ut_ref[...], preferred_element_type=f32)    # (B*n, n) f32
    w_eff_t = jt_ref[...][None, :, :] * m.reshape(batch, n, n)    # (B, n, n) f32

    # rec[b, j] = sum_i r0[b, i] * W_eff[b]^T[i, j]
    # (B=2, n=64 -> a handful of vregs: VPU multiply + sublane reduce; avoids an
    #  M=1 batched MXU matvec.)
    rec = jnp.sum(r0[:, :, None] * w_eff_t, axis=1)               # (B, n) f32

    # ---- Euler update (state stays in f32 scratch) ----
    x_new = x + alpha * (-x + rec + drive)
    x_scr[...] = x_new

    # Single lane-dense (B, 2n) = (2, 128) store; wrapper splits hidden / act.
    r_ref[0] = jnp.concatenate([x_new, jnp.tanh(x_new)], axis=-1).astype(r_ref.dtype)


def rnn_static_bg_rollout(params, bg_inputs, cues, x0):
    """T fused forward steps of RNNStaticBG.

    bg_inputs: (T, B, d_bg), cues: (T, B, d_cue), x0: (B, n).
    Each grid step reproduces one call of the module's forward.
    Returns dict(r_hidden, r_act: (T, B, n); bg_act: (T, B, nbg)).
    """
    nsteps, batch, d_bg = bg_inputs.shape
    _, _, d_cue = cues.shape
    _, n = x0.shape
    nbg = params["vt"].shape[1]
    hsz = params["w1"].shape[1]

    mxu_dtype = jnp.bfloat16 if MXU_BF16 else jnp.float32
    w1 = params["w1"].astype(mxu_dtype)
    w2 = params["w2"].astype(mxu_dtype)
    ut = params["ut"].astype(mxu_dtype)
    win_t = params["win_t"].astype(mxu_dtype)

    step_map3 = lambda t: (t, 0, 0)   # per-timestep blocks
    const2 = lambda t: (0, 0)         # resident weight blocks

    kernel = functools.partial(_rnn_static_bg_kernel, alpha=DT / TAU)

    grid_spec = pltpu.PrefetchScalarGridSpec(
        num_scalar_prefetch=0,
        grid=(nsteps,),
        in_specs=[
            pl.BlockSpec((1, batch, d_bg), step_map3),     # bg_inputs
            pl.BlockSpec((1, batch, d_cue), step_map3),    # cues
            pl.BlockSpec((batch, n), const2),              # x0
            pl.BlockSpec((d_bg, hsz), const2),             # w1
            pl.BlockSpec((1, hsz), const2),                # b1
            pl.BlockSpec((hsz, nbg), const2),              # w2
            pl.BlockSpec((1, nbg), const2),                # b2
            pl.BlockSpec((n, n), const2),                  # jt
            pl.BlockSpec((n, nbg), const2),                # vt
            pl.BlockSpec((nbg, n), const2),                # ut
            pl.BlockSpec((d_cue, n), const2),              # win_t
            pl.BlockSpec((1, n), const2),                  # b_in
        ],
        out_specs=(
            pl.BlockSpec((1, batch, 2 * n), step_map3),    # packed [hidden | act]
            pl.BlockSpec((1, batch, nbg), step_map3),      # bg_act
        ),
        scratch_shapes=[pltpu.VMEM((batch, n), jnp.float32)],
    )

    r_packed, bg_act = pl.pallas_call(
        kernel,
        out_shape=(
            jax.ShapeDtypeStruct((nsteps, batch, 2 * n), jnp.float32),
            jax.ShapeDtypeStruct((nsteps, batch, nbg), jnp.float32),
        ),
        grid_spec=grid_spec,
        compiler_params=pltpu.CompilerParams(
            dimension_semantics=("arbitrary",)),   # sequential: state carried in scratch
    )(
        bg_inputs, cues, x0,
        w1, params["b1"], w2, params["b2"],
        params["jt"], params["vt"], ut, win_t, params["b_in"],
    )

    return {
        "r_hidden": r_packed[..., :n],
        "r_act": r_packed[..., n:],
        "bg_act": bg_act,
    }


def init_params(key):
    """Deterministic synthetic parameters matching the module's __init__ shapes."""
    ks = jax.random.split(key, 9)
    f32 = jnp.float32
    # BG MLP: input_size -> bg_layer_sizes=(16,) -> nbg, with bias
    w1 = jax.random.normal(ks[0], (BG_INPUT_SIZE, BG_HIDDEN), f32) / jnp.sqrt(BG_INPUT_SIZE)
    b1 = 0.1 * jax.random.normal(ks[5], (1, BG_HIDDEN), f32)
    w2 = jax.random.normal(ks[1], (BG_HIDDEN, NBG), f32) / jnp.sqrt(BG_HIDDEN)
    b2 = 0.1 * jax.random.normal(ks[6], (1, NBG), f32)
    # ThalamicRNN: J (g0-scaled), thalamic loadings U, V, one input source "cue"
    j = G0 / jnp.sqrt(NNEURONS) * jax.random.normal(ks[2], (NNEURONS, NNEURONS), f32)
    u = jax.random.normal(ks[3], (NNEURONS, NBG), f32) / jnp.sqrt(NBG)
    v = jax.random.normal(ks[4], (NBG, NNEURONS), f32) / jnp.sqrt(NNEURONS)
    win = jax.random.normal(ks[7], (NNEURONS, CUE_SIZE), f32) / jnp.sqrt(CUE_SIZE)
    b_in = 0.1 * jax.random.normal(ks[8], (1, NNEURONS), f32)
    return {
        "w1": w1, "b1": b1, "w2": w2, "b2": b2,
        "jt": j.T, "vt": v.T, "ut": u.T,       # pre-transposed for row-vector matmuls
        "win_t": win.T, "b_in": b_in,
    }


def _reference_rollout(params, bg_inputs, cues, x0):
    """Pure-JAX f32 reference of T calls of the module forward."""
    alpha = DT / TAU
    x = x0
    rh, ra, bg = [], [], []
    for t in range(bg_inputs.shape[0]):
        h = jnp.maximum(bg_inputs[t] @ params["w1"] + params["b1"], 0.0)
        g = h @ params["w2"] + params["b2"]                       # (B, nbg)
        drive = cues[t] @ params["win_t"] + params["b_in"]        # (B, n)
        # W_eff[b]^T = J^T * (V^T diag(g_b) U^T)
        w_eff_t = params["jt"][None] * jnp.einsum(
            "nk,bk,km->bnm", params["vt"], g, params["ut"])
        rec = jnp.einsum("bn,bnm->bm", jnp.tanh(x), w_eff_t)
        x = x + alpha * (-x + rec + drive)
        rh.append(x)
        ra.append(jnp.tanh(x))
        bg.append(g)
    return jnp.stack(rh), jnp.stack(ra), jnp.stack(bg)


if __name__ == "__main__":
    key = jax.random.PRNGKey(0)
    kp, kb, kc, kx = jax.random.split(key, 4)

    params = init_params(kp)
    bg_inputs = jax.random.normal(kb, (NSTEPS, BATCH, BG_INPUT_SIZE), jnp.float32)
    cues = jax.random.normal(kc, (NSTEPS, BATCH, CUE_SIZE), jnp.float32)
    x0 = 0.1 * jax.random.normal(kx, (BATCH, NNEURONS), jnp.float32)

    out = rnn_static_bg_rollout(params, bg_inputs, cues, x0)
    jax.block_until_ready(out)

    assert out["r_hidden"].shape == (NSTEPS, BATCH, NNEURONS)
    assert out["r_act"].shape == (NSTEPS, BATCH, NNEURONS)
    assert out["bg_act"].shape == (NSTEPS, BATCH, NBG)

    # Loose-tolerance sanity check vs a pure-JAX f32 reference (bf16 MXU inputs
    # add ~1e-3 relative error per step; plumbing bugs would be O(1)).
    rh_ref, ra_ref, bg_ref = _reference_rollout(params, bg_inputs, cues, x0)
    assert jnp.allclose(out["bg_act"], bg_ref, atol=1e-1, rtol=1e-1)
    assert jnp.allclose(out["r_hidden"], rh_ref, atol=1e-1, rtol=1e-1)
    assert jnp.allclose(out["r_act"], ra_ref, atol=1e-1, rtol=1e-1)

    print("KERNEL_OK")
</pallas_src>

<mosaic_0001>
module attributes {stable_mosaic.version = 11 : i64} {
  func.func @_rnn_static_bg_kernel(%arg0: i32, %arg1: memref<1x2x4xf32, #tpu.memory_space<vmem>>, %arg2: memref<1x2x3xf32, #tpu.memory_space<vmem>>, %arg3: memref<2x64xf32, #tpu.memory_space<vmem>>, %arg4: memref<4x16xbf16, #tpu.memory_space<vmem>>, %arg5: memref<1x16xf32, #tpu.memory_space<vmem>>, %arg6: memref<16x20xbf16, #tpu.memory_space<vmem>>, %arg7: memref<1x20xf32, #tpu.memory_space<vmem>>, %arg8: memref<64x64xf32, #tpu.memory_space<vmem>>, %arg9: memref<64x20xf32, #tpu.memory_space<vmem>>, %arg10: memref<20x64xbf16, #tpu.memory_space<vmem>>, %arg11: memref<3x64xbf16, #tpu.memory_space<vmem>>, %arg12: memref<1x64xf32, #tpu.memory_space<vmem>>, %arg13: memref<1x2x128xf32, #tpu.memory_space<vmem>>, %arg14: memref<1x2x20xf32, #tpu.memory_space<vmem>>, %arg15: memref<2x64xf32, #tpu.memory_space<vmem>>) attributes {dimension_semantics = [#tpu.dimension_semantics<arbitrary>], iteration_bounds = array<i64: 8>, scalar_prefetch = 0 : i64, scratch_operands = 1 : i64, tpu.core_type = #tpu.core_type<tc>, window_params = [{transform_indices = @transform_0, window_bounds = array<i64: 1, 2, 4>}, {transform_indices = @transform_1, window_bounds = array<i64: 1, 2, 3>}, {pipeline_mode = #tpu.pipeline_mode<synchronous>, transform_indices = @transform_2, window_bounds = array<i64: 2, 64>}, {pipeline_mode = #tpu.pipeline_mode<synchronous>, transform_indices = @transform_3, window_bounds = array<i64: 4, 16>}, {pipeline_mode = #tpu.pipeline_mode<synchronous>, transform_indices = @transform_4, window_bounds = array<i64: 1, 16>}, {pipeline_mode = #tpu.pipeline_mode<synchronous>, transform_indices = @transform_5, window_bounds = array<i64: 16, 20>}, {pipeline_mode = #tpu.pipeline_mode<synchronous>, transform_indices = @transform_6, window_bounds = array<i64: 1, 20>}, {pipeline_mode = #tpu.pipeline_mode<synchronous>, transform_indices = @transform_7, window_bounds = array<i64: 64, 64>}, {pipeline_mode = #tpu.pipeline_mode<synchronous>, transform_indices = @transform_8, window_bounds = array<i64: 64, 20>}, {pipeline_mode = #tpu.pipeline_mode<synchronous>, transform_indices = @transform_9, window_bounds = array<i64: 20, 64>}, {pipeline_mode = #tpu.pipeline_mode<synchronous>, transform_indices = @transform_10, window_bounds = array<i64: 3, 64>}, {pipeline_mode = #tpu.pipeline_mode<synchronous>, transform_indices = @transform_11, window_bounds = array<i64: 1, 64>}, {transform_indices = @transform_12, window_bounds = array<i64: 1, 2, 128>}, {transform_indices = @transform_13, window_bounds = array<i64: 1, 2, 20>}]} {
    %c0_i32 = arith.constant 0 : i32
    %0 = arith.cmpi eq, %arg0, %c0_i32 : i32
    %1 = arith.extui %0 : i1 to i32
    %c0_i32_0 = arith.constant 0 : i32
    %2 = arith.cmpi ne, %1, %c0_i32_0 : i32
    scf.if %2 {
      %c0_41 = arith.constant 0 : index
      %c0_42 = arith.constant 0 : index
      %64 = vector.load %arg3[%c0_41, %c0_42] : memref<2x64xf32, #tpu.memory_space<vmem>>, vector<2x64xf32>
      %c0_43 = arith.constant 0 : index
      %c0_44 = arith.constant 0 : index
      %65 = vector.load %arg15[%c0_43, %c0_44] : memref<2x64xf32, #tpu.memory_space<vmem>>, vector<2x64xf32>
      tpu.vector_store %arg15[%c0_43, %c0_44], %64 {strides = array<i32>} : memref<2x64xf32, #tpu.memory_space<vmem>>, vector<2x64xf32>,
    } else {
    }
    %c0 = arith.constant 0 : index
    %c0_1 = arith.constant 0 : index
    %3 = vector.load %arg15[%c0, %c0_1] : memref<2x64xf32, #tpu.memory_space<vmem>>, vector<2x64xf32>
    %4 = math.tanh %3 : vector<2x64xf32>
    %c0_2 = arith.constant 0 : index
    %c0_3 = arith.constant 0 : index
    %c0_4 = arith.constant 0 : index
    %5 = vector.load %arg1[%c0_2, %c0_3, %c0_4] : memref<1x2x4xf32, #tpu.memory_space<vmem>>, vector<1x2x4xf32>
    %6 = vector.shape_cast %5 : vector<1x2x4xf32> to vector<2x4xf32>
    %7 = arith.truncf %6 : vector<2x4xf32> to vector<2x4xbf16>
    %c0_5 = arith.constant 0 : index
    %c0_6 = arith.constant 0 : index
    %8 = vector.load %arg4[%c0_5, %c0_6] : memref<4x16xbf16, #tpu.memory_space<vmem>>, vector<4x16xbf16>
    %cst = arith.constant dense<0.000000e+00> : vector<2x16xf32>
    %9 = tpu.matmul %7, %8, %cst {dimension_numbers = #tpu.dot_dimension_numbers<[1], [0], [0], [1], [0, 0, 1, 1], [], []>} : vector<2x4xbf16>, vector<4x16xbf16>, vector<2x16xf32> -> vector<2x16xf32>
    %c0_7 = arith.constant 0 : index
    %c0_8 = arith.constant 0 : index
    %10 = vector.load %arg5[%c0_7, %c0_8] : memref<1x16xf32, #tpu.memory_space<vmem>>, vector<1x16xf32>
    %11 = vector.broadcast %10 : vector<1x16xf32> to vector<2x16xf32>
    %12 = arith.addf %9, %11 : vector<2x16xf32>
    %cst_9 = arith.constant 0.000000e+00 : f32
    %13 = vector.broadcast %cst_9 : f32 to vector<2x16xf32>
    %14 = arith.maximumf %12, %13 : vector<2x16xf32>
    %15 = arith.truncf %14 : vector<2x16xf32> to vector<2x16xbf16>
    %c0_10 = arith.constant 0 : index
    %c0_11 = arith.constant 0 : index
    %16 = vector.load %arg6[%c0_10, %c0_11] : memref<16x20xbf16, #tpu.memory_space<vmem>>, vector<16x20xbf16>
    %cst_12 = arith.constant dense<0.000000e+00> : vector<2x20xf32>
    %17 = tpu.matmul %15, %16, %cst_12 {dimension_numbers = #tpu.dot_dimension_numbers<[1], [0], [0], [1], [0, 0, 1, 1], [], []>} : vector<2x16xbf16>, vector<16x20xbf16>, vector<2x20xf32> -> vector<2x20xf32>
    %c0_13 = arith.constant 0 : index
    %c0_14 = arith.constant 0 : index
    %18 = vector.load %arg7[%c0_13, %c0_14] : memref<1x20xf32, #tpu.memory_space<vmem>>, vector<1x20xf32>
    %19 = vector.broadcast %18 : vector<1x20xf32> to vector<2x20xf32>
    %20 = arith.addf %17, %19 : vector<2x20xf32>
    %c0_15 = arith.constant 0 : index
    %c0_16 = arith.constant 0 : index
    %c0_17 = arith.constant 0 : index
    %21 = vector.load %arg14[%c0_15, %c0_16, %c0_17] : memref<1x2x20xf32, #tpu.memory_space<vmem>>, vector<1x2x20xf32>
    %22 = vector.shape_cast %21 : vector<1x2x20xf32> to vector<2x20xf32>
    %23 = vector.shape_cast %20 : vector<2x20xf32> to vector<1x2x20xf32>
    tpu.vector_store %arg14[%c0_15, %c0_16, %c0_17], %23 {strides = array<i32>} : memref<1x2x20xf32, #tpu.memory_space<vmem>>, vector<1x2x20xf32>,
    %c0_18 = arith.constant 0 : index
    %c0_19 = arith.constant 0 : index
    %c0_20 = arith.constant 0 : index
    %24 = vector.load %arg2[%c0_18, %c0_19, %c0_20] : memref<1x2x3xf32, #tpu.memory_space<vmem>>, vector<1x2x3xf32>
    %25 = vector.shape_cast %24 : vector<1x2x3xf32> to vector<2x3xf32>
    %26 = arith.truncf %25 : vector<2x3xf32> to vector<2x3xbf16>
    %c0_21 = arith.constant 0 : index
    %c0_22 = arith.constant 0 : index
    %27 = vector.load %arg11[%c0_21, %c0_22] : memref<3x64xbf16, #tpu.memory_space<vmem>>, vector<3x64xbf16>
    %cst_23 = arith.constant dense<0.000000e+00> : vector<2x64xf32>
    %28 = tpu.matmul %26, %27, %cst_23 {dimension_numbers = #tpu.dot_dimension_numbers<[1], [0], [0], [1], [0, 0, 1, 1], [], []>} : vector<2x3xbf16>, vector<3x64xbf16>, vector<2x64xf32> -> vector<2x64xf32>
    %c0_24 = arith.constant 0 : index
    %c0_25 = arith.constant 0 : index
    %29 = vector.load %arg12[%c0_24, %c0_25] : memref<1x64xf32, #tpu.memory_space<vmem>>, vector<1x64xf32>
    %30 = vector.broadcast %29 : vector<1x64xf32> to vector<2x64xf32>
    %31 = arith.addf %28, %30 : vector<2x64xf32>
    %c0_26 = arith.constant 0 : index
    %c0_27 = arith.constant 0 : index
    %32 = vector.load %arg9[%c0_26, %c0_27] : memref<64x20xf32, #tpu.memory_space<vmem>>, vector<64x20xf32>
    %33 = vector.shape_cast %32 : vector<64x20xf32> to vector<1x64x20xf32>
    %34 = vector.shape_cast %20 : vector<2x20xf32> to vector<2x1x20xf32>
    %35 = vector.broadcast %33 : vector<1x64x20xf32> to vector<2x64x20xf32>
    %36 = vector.broadcast %34 : vector<2x1x20xf32> to vector<2x64x20xf32>
    %37 = arith.mulf %35, %36 : vector<2x64x20xf32>
    %38 = vector.shape_cast %37 : vector<2x64x20xf32> to vector<128x20xf32>
    %39 = arith.truncf %38 : vector<128x20xf32> to vector<128x20xbf16>
    %c0_28 = arith.constant 0 : index
    %c0_29 = arith.constant 0 : index
    %40 = vector.load %arg10[%c0_28, %c0_29] : memref<20x64xbf16, #tpu.memory_space<vmem>>, vector<20x64xbf16>
    %cst_30 = arith.constant dense<0.000000e+00> : vector<128x64xf32>
    %41 = tpu.matmul %39, %40, %cst_30 {dimension_numbers = #tpu.dot_dimension_numbers<[1], [0], [0], [1], [0, 0, 1, 1], [], []>} : vector<128x20xbf16>, vector<20x64xbf16>, vector<128x64xf32> -> vector<128x64xf32>
    %c0_31 = arith.constant 0 : index
    %c0_32 = arith.constant 0 : index
    %42 = vector.load %arg8[%c0_31, %c0_32] : memref<64x64xf32, #tpu.memory_space<vmem>>, vector<64x64xf32>
    %43 = vector.shape_cast %42 : vector<64x64xf32> to vector<1x64x64xf32>
    %44 = vector.shape_cast %41 : vector<128x64xf32> to vector<2x64x64xf32>
    %45 = vector.broadcast %43 : vector<1x64x64xf32> to vector<2x64x64xf32>
    %46 = arith.mulf %45, %44 : vector<2x64x64xf32>
    %47 = vector.shape_cast %4 : vector<2x64xf32> to vector<2x64x1xf32>
    %48 = vector.broadcast %47 : vector<2x64x1xf32> to vector<2x64x64xf32>
    %49 = arith.mulf %48, %46 : vector<2x64x64xf32>
    %cst_33 = arith.constant dense<0.000000e+00> : vector<2x64xf32>
    %50 = vector.multi_reduction <add>, %49, %cst_33 [1] : vector<2x64x64xf32> to vector<2x64xf32>
    %cst_34 = arith.constant 0.000000e+00 : f32
    %51 = vector.broadcast %cst_34 : f32 to vector<2x64xf32>
    %52 = arith.subf %51, %3 : vector<2x64xf32>
    %53 = arith.addf %52, %50 : vector<2x64xf32>
    %54 = arith.addf %53, %31 : vector<2x64xf32>
    %cst_35 = arith.constant 0.333333343 : f32
    %55 = vector.broadcast %cst_35 : f32 to vector<2x64xf32>
    %56 = arith.mulf %55, %54 : vector<2x64xf32>
    %57 = arith.addf %3, %56 : vector<2x64xf32>
    %c0_36 = arith.constant 0 : index
    %c0_37 = arith.constant 0 : index
    %58 = vector.load %arg15[%c0_36, %c0_37] : memref<2x64xf32, #tpu.memory_space<vmem>>, vector<2x64xf32>
    tpu.vector_store %arg15[%c0_36, %c0_37], %57 {strides = array<i32>} : memref<2x64xf32, #tpu.memory_space<vmem>>, vector<2x64xf32>,
    %59 = math.tanh %57 : vector<2x64xf32>
    %60 = tpu.concatenate %57, %59 in 1 : vector<2x64xf32>, vector<2x64xf32> -> vector<2x128xf32>
    %c0_38 = arith.constant 0 : index
    %c0_39 = arith.constant 0 : index
    %c0_40 = arith.constant 0 : index
    %61 = vector.load %arg13[%c0_38, %c0_39, %c0_40] : memref<1x2x128xf32, #tpu.memory_space<vmem>>, vector<1x2x128xf32>
    %62 = vector.shape_cast %61 : vector<1x2x128xf32> to vector<2x128xf32>
    %63 = vector.shape_cast %60 : vector<2x128xf32> to vector<1x2x128xf32>
    tpu.vector_store %arg13[%c0_38, %c0_39, %c0_40], %63 {strides = array<i32>} : memref<1x2x128xf32, #tpu.memory_space<vmem>>, vector<1x2x128xf32>,
    return
  }
  func.func @transform_0(%arg0: i32) -> (i32, i32, i32) {
    %c0_i32 = arith.constant 0 : i32
    %c0_i32_0 = arith.constant 0 : i32
    %c0_i32_1 = arith.constant 0 : i32
    return %arg0, %c0_i32, %c0_i32_0 : i32, i32, i32
  }
  func.func @transform_1(%arg0: i32) -> (i32, i32, i32) {
    %c0_i32 = arith.constant 0 : i32
    %c0_i32_0 = arith.constant 0 : i32
    %c0_i32_1 = arith.constant 0 : i32
    return %arg0, %c0_i32, %c0_i32_0 : i32, i32, i32
  }
  func.func @transform_2(%arg0: i32) -> (i32, i32) {
    %c0_i32 = arith.constant 0 : i32
    %c0_i32_0 = arith.constant 0 : i32
    %c0_i32_1 = arith.constant 0 : i32
    return %c0_i32, %c0_i32_0 : i32, i32
  }
  func.func @transform_3(%arg0: i32) -> (i32, i32) {
    %c0_i32 = arith.constant 0 : i32
    %c0_i32_0 = arith.constant 0 : i32
    %c0_i32_1 = arith.constant 0 : i32
    return %c0_i32, %c0_i32_0 : i32, i32
  }
  func.func @transform_4(%arg0: i32) -> (i32, i32) {
    %c0_i32 = arith.constant 0 : i32
    %c0_i32_0 = arith.constant 0 : i32
    %c0_i32_1 = arith.constant 0 : i32
    return %c0_i32, %c0_i32_0 : i32, i32
  }
  func.func @transform_5(%arg0: i32) -> (i32, i32) {
    %c0_i32 = arith.constant 0 : i32
    %c0_i32_0 = arith.constant 0 : i32
    %c0_i32_1 = arith.constant 0 : i32
    return %c0_i32, %c0_i32_0 : i32, i32
  }
  func.func @transform_6(%arg0: i32) -> (i32, i32) {
    %c0_i32 = arith.constant 0 : i32
    %c0_i32_0 = arith.constant 0 : i32
    %c0_i32_1 = arith.constant 0 : i32
    return %c0_i32, %c0_i32_0 : i32, i32
  }
  func.func @transform_7(%arg0: i32) -> (i32, i32) {
    %c0_i32 = arith.constant 0 : i32
    %c0_i32_0 = arith.constant 0 : i32
    %c0_i32_1 = arith.constant 0 : i32
    return %c0_i32, %c0_i32_0 : i32, i32
  }
  func.func @transform_8(%arg0: i32) -> (i32, i32) {
    %c0_i32 = arith.constant 0 : i32
    %c0_i32_0 = arith.constant 0 : i32
    %c0_i32_1 = arith.constant 0 : i32
    return %c0_i32, %c0_i32_0 : i32, i32
  }
  func.func @transform_9(%arg0: i32) -> (i32, i32) {
    %c0_i32 = arith.constant 0 : i32
    %c0_i32_0 = arith.constant 0 : i32
    %c0_i32_1 = arith.constant 0 : i32
    return %c0_i32, %c0_i32_0 : i32, i32
  }
  func.func @transform_10(%arg0: i32) -> (i32, i32) {
    %c0_i32 = arith.constant 0 : i32
    %c0_i32_0 = arith.constant 0 : i32
    %c0_i32_1 = arith.constant 0 : i32
    return %c0_i32, %c0_i32_0 : i32, i32
  }
  func.func @transform_11(%arg0: i32) -> (i32, i32) {
    %c0_i32 = arith.constant 0 : i32
    %c0_i32_0 = arith.constant 0 : i32
    %c0_i32_1 = arith.constant 0 : i32
    return %c0_i32, %c0_i32_0 : i32, i32
  }
  func.func @transform_12(%arg0: i32) -> (i32, i32, i32) {
    %c0_i32 = arith.constant 0 : i32
    %c0_i32_0 = arith.constant 0 : i32
    %c0_i32_1 = arith.constant 0 : i32
    return %arg0, %c0_i32, %c0_i32_0 : i32, i32, i32
  }
  func.func @transform_13(%arg0: i32) -> (i32, i32, i32) {
    %c0_i32 = arith.constant 0 : i32
    %c0_i32_0 = arith.constant 0 : i32
    %c0_i32_1 = arith.constant 0 : i32
    return %arg0, %c0_i32, %c0_i32_0 : i32, i32, i32
  }
}

</mosaic_0001>

<bundles_post_ra>
// kernel: tpu_custom_call.1
= control target key start
LH: loop header
LB: loop body
LE: loop exit
PB: predicated region body
PF: predicated region fallthrough
CT: control target
= control target key end

     0   :  { %19 = vsyncpa [#allocation4], 0  ;;  %s1577_s0 = inlined_call_operand.vmem [shape: f32[8,2,4], index: 0, kind: input, shape index: {}]   ;;  %s1578_s1 = inlined_call_operand.vmem [shape: f32[8,2,3], index: 1, kind: input, shape index: {}]   ;;  %s1579_s2 = inlined_call_operand.vmem [shape: f32[2,64], index: 2, kind: input, shape index: {}]   ;;  %s1580_s3 = inlined_call_operand.vmem [shape: bf16[4,16], index: 3, kind: input, shape index: {}]   ;;  %s1581_s4 = inlined_call_operand.vmem [shape: f32[1,16], index: 4, kind: input, shape index: {}]   ;;  %s1582_s5 = inlined_call_operand.vmem [shape: bf16[16,20], index: 5, kind: input, shape index: {}]   ;;  %s1583_s6 = inlined_call_operand.vmem [shape: f32[1,20], index: 6, kind: input, shape index: {}]   ;;  %s1584_s7 = inlined_call_operand.vmem [shape: f32[64,64], index: 7, kind: input, shape index: {}]   ;;  %s1585_s8 = inlined_call_operand.vmem [shape: f32[64,20], index: 8, kind: input, shape index: {}]   ;;  %s1586_s9 = inlined_call_operand.vmem [shape: bf16[20,64], index: 9, kind: input, shape index: {}]   ;;  %s1587_s10 = inlined_call_operand.vmem [shape: bf16[3,64], index: 10, kind: input, shape index: {}]   ;;  %s1588_s11 = inlined_call_operand.vmem [shape: f32[1,64], index: 11, kind: input, shape index: {}]   ;;  %s1589_s12 = inlined_call_operand.hbm [shape: f32[8,2,128], index: 12, kind: output, shape index: {0}]   ;;  %s1590_s13 = inlined_call_operand.hbm [shape: f32[8,2,20], index: 13, kind: output, shape index: {1}]  }
   0x1   :  { %21 = vsyncpa [#allocation4 + $0x1], 0 }
   0x2   :  { %22 = vsyncpa [#allocation6], 0 }
   0x3   :  { %24 = vsyncpa [#allocation6 + $0x1], 0  ;;  %s1310_s25 = smov 0   ;;  %s1312_s26 = smov 0  }
   0x4   :  { %s1314_s27 = smov 0   ;;  %s1316_s28 = smov 0  }
   0x5 LB: > { %1597 = sst [smem:[#allocation9_spill]] %s1224_s25  ;;  %s1331_s29 = sadd.s32 4294967295, %s1236_s28   ;;  %s1236_s28 = sphi %s1316_s28, %s1607_s28   ;;  %s1232_s27 = sphi %s1314_s27, %s1610_s27   ;;  %s1228_s26 = sphi %s1312_s26, %s1609_s26   ;;  %s1224_s25 = sphi %s1310_s25, %s1608_s25  }
   0x6   : > { %1598 = sst [smem:[#allocation10_spill]] %s1228_s26  ;;  %s1031_s30 = sadd.s32 4294967294, %s1236_s28  }
   0x7   : > { %1599 = sst [smem:[#allocation11_spill]] %s1232_s27  ;;  %s1335_s14 = sadd.s32 1, %s1236_s28  }
   0x8   : > { %1600 = sst [smem:[#allocation12_spill]] %s1335_s14  ;;  %s299_s15 = sadd.s32 1, %s1232_s27 }
   0x9   : > { %s296_s16 = ssub.s32 %s1236_s28, %s1335_s14  ;;  %p309_p0 = scmp.ne.s32.totalorder %s1232_s27, %s1228_s26 }
   0xa   : > { %p297_p1 = scmp.eq.s32.totalorder %s296_s16, 0  ;;  %p310_p2 = scmp.eq.s32.totalorder %s1331_s29, 7 }
   0xb   : > { %p315_p3 = scmp.ne.s32.totalorder %s1228_s26, %s1224_s25  ;;  %p316_p4 = scmp.eq.s32.totalorder %s1031_s30, 7 }
   0xc   : > { %s1346_s17 = scalar_select %p297_p1, %s1232_s27, %s299_s15  }
   0xd   : > { %p1348_p5 = por %p310_p2, %p309_p0  ;;  %p1352_p6 = por %p316_p4, %p315_p3 }
   0xe   : > { %1601 = sst [smem:[#allocation13_spill]] %s1346_s17  ;;  %p1034_p7 = scmp.ge.s32.totalorder %s1236_s28, 1 }
   0xf   : > { %s1603_s19 = scalar_select %p1352_p6, 1, 0 }
  0x10   : > { %p404_p8 = scmp.lt.s32.totalorder %s1236_s28, 9 }
  0x11   : > { %1604 = sst [smem:[#allocation14_spill]] %s1603_s19 }
  0x12   : > { %p405_p9 = pnand %p1034_p7, %p404_p8 }
  0x13   : > { %s1359_s20 = sand.u32 (!%p405_p9), 1, %s1228_s26   ;;  %p456_p10 = scmp.lt.s32.totalorder (!%p405_p9), %s1331_s29, 7 }
  0x14   : > { %408 = sbr.rel (%p405_p9) target bundleno = 632 (0x278), region = 68  ;;  %s1035_s21 = sshll.u32 (!%p405_p9), %s1359_s20, 1 }
  0x15   : > { %s1372_s14 = scalar_lea.vmem (!%p405_p9), [#allocation3], %s1035_s21  ;;  %s1374_s19 = scalar_lea.vmem (!%p405_p9), [#allocation5], %s1035_s21 }
  0x16   : > { %p1039_p11 = scmp.ne.s32.totalorder (!%p405_p9), %s1331_s29, 0 }
  0x19   : > { %s457_s22 = scalar_select %p456_p10, %s1331_s29, 7 }
  0x1a   : > { %468 = sbr.rel (%p1039_p11) target bundleno = 33 (0x21), region = 72 }
  0x1b   : > { %s1037_s23 = sshll.u32 %s457_s22, 1 }
  0x1c   : > { %s459_s15 = scalar_lea.vmem %s1577_s0, %s1037_s23  ;;  %s1370_s27 = scalar_lea.vmem %s1578_s1, %s1037_s23 }
  0x1f   : > { %v469_v0 = vld [vmem:[%s1579_s2] sm:$0x3]  ;;  %vm470_vm0 = vcmask 517120  }
  0x20   : > { %471 = vst.msk [vmem:[#allocation2] sm:$0x3] %vm470_vm0, %v469_v0 }
  0x21 PF: > { %v476_v1 = vld [vmem:[%s1580_s3] sm:$0x3]  ;;  %vm485_vm1 = vcmask 1041408   ;;  %vm481_vm2 = vcmask 31744   ;;  %v717_v6 = vlaneseq  ;;  %vm546_vm3 = vcmask 1040384   ;;  %v566_v40 = vld [vmem:[%s1585_s8 + $0x8] sm:$0xff] }
  0x22   : > { %v474_v2 = vld [vmem:[%s459_s15] sm:$0x3]  ;;  %v487_v3 = vsel %vm485_vm1, %v476_v1, 0  ;;  %v1238_v11 = vmov 65535   ;;  %vm542_vm4 = vcmask 23552   ;;  %vm516_vm5 = vcmask 130048  }
  0x23   : > { %v475_v4 = vpack.c.bf16 %v474_v2, %v474_v2  ;;  %496 = vmatpush.bf16.msra.mxu0 %v487_v3  ;;  %v1065_v5 = vld [vmem:[%s1582_s5] sm:$0xff]  ;;  %v1390_v8 = vshrl.u32 %v717_v6, 7  ;;  %v547_v12 = vsel %vm546_vm3, 4294967295, %v1238_v11  ;;  %v605_v21 = vld [vmem:[%s1586_s9 + $0x8] sm:$0x3]  ;;  %vm533_vm6 = vcmask 156672  }
  0x24   : > { %527 = vmatpush.bf16.msra.mxu1 %v1065_v5  ;;  %v537_v10 = vld [vmem:[%s1587_s10] sm:$0x3]  ;;  %v548_v14 = vsel %vm485_vm1, %v547_v12, 0  ;;  %v611_v23 = vunpack.c.l.b16 %v605_v21  ;;  %v570_v42 = vld [vmem:[%s1585_s8 + $0x28] sm:$0xff]  ;;  %v571_v45 = vld [vmem:[%s1585_s8 + $0x30] sm:$0xff]  ;;  %vm615_vm7 = vcmask 162816  }
  0x25   : > { %1121 = vset.pattern.permute.xlu1 %v1390_v8  ;;  %1119 = vset.pattern.permute.xlu0 %v1390_v8  ;;  %v731_v9 = vadd.s32 16, %v1390_v8  ;;  %v550_v16 = vand.u32 %v548_v14, %v537_v10  ;;  %v535_v18 = vld [vmem:[%s1370_s27] sm:$0x3]  ;;  %v725_v20 = vadd.s32 8, %v1390_v8  ;;  %v737_v29 = vadd.s32 24, %v1390_v8  ;;  %v572_v46 = vld [vmem:[%s1585_s8 + $0x38] sm:$0xff] }
  0x26   : > { %1040 = vmatmul.msk.bf16.vlgmr.msra.gmra.mxu0 %vm481_vm2, %v475_v4  ;;  %v536_v19 = vpack.c.bf16 %v535_v18, %v535_v18  ;;  %v1135_v22 = vld [vmem:[%s1581_s4] ss:$0 sm:$0xff]  ;;  %v613_v24 = vpack.c.b16 %v611_v23, %v611_v23  ;;  %v743_v32 = vadd.s32 32, %v1390_v8  ;;  %v749_v34 = vadd.s32 40, %v1390_v8  ;;  %v567_v54 = vld [vmem:[%s1585_s8 + $0x10] sm:$0xff]  ;;  %v568_v55 = vld [vmem:[%s1585_s8 + $0x18] sm:$0xff] }
  0x27   : > { %v1387_v7 = vld [vmem:[#allocation2] sm:$0x3]  ;;  %1123 = vset.pattern.permute.xlu2 %v731_v9  ;;  %559 = vmatpush.bf16.msra.mxu2 %v550_v16  ;;  %v761_v35 = vadd.s32 56, %v1390_v8  ;;  %v755_v63 = vadd.s32 48, %v1390_v8  ;;  %vm830_vm8 = vcmask 523264   ;;  %vm876_vm9 = vcmask 1041409  }
  0x28   : > { %1138 = vtanh.f32 %v1387_v7  ;;  %v641_v27 = vsel %vm485_vm1, %v613_v24, 0  ;;  %v1066_v33 = vld [vmem:[%s1586_s9] sm:$0xff]  ;;  %s1061_s25 = sshll.u32 %s1331_s29, 1  ;;  %s924_s15 = sshll.u32 %s1374_s19, 4  ;;  %vm883_vm10 = vcmask 517120   ;;  %s925_s15 = int_to_ptr.vmem [resolvable:$true] %s924_s15 }
  0x29   : > { %649 = vmatpush.bf16.msrb.mxu0 %v641_v27  ;;  %1067 = vmatpush.bf16.msrb.mxu1 %v641_v27  ;;  %v1136_v36 = vld [vmem:[%s1583_s6] ss:$0 sm:$0xff]  ;;  %s922_s30 = scalar_lea.hbm %s1590_s13, %s1061_s25  ;;  %s898_s27 = scalar_lea.sflag [#allocation6], %s1359_s20 }
  0x2a   : > { %1046 = vmatmul.msk.bf16.vlgmr.msra.gmra.mxu2 %vm542_vm4, %v536_v19  ;;  %1069 = vmatpush.bf16.msra.mxu3 %v641_v27  ;;  %v565_v39 = vld [vmem:[%s1585_s8] sm:$0xff]  ;;  %s926_s16 = sshll.u32 %s922_s30, 4  ;;  %s1162_s21 = scalar_lea.hbm %s1590_s13, 16  ;;  %s927_s16 = int_to_ptr.hbm [resolvable:$true] %s926_s16 }
  0x2b   : > { %1068 = vmatpush.bf16.msrb.mxu2 %v641_v27  ;;  %v569_v41 = vld [vmem:[%s1585_s8 + $0x20] sm:$0xff]  ;;  %s1156_s22 = sshra.s32 %s927_s16, 4  ;;  %s1157_s22 = int_to_ptr.hbm [resolvable:$true] %s1156_s22 }
  0x2c   : > { %s1158_s24 = scalar_lea.hbm %s1157_s22, 2  ;;  %p1163_p1 = scmp.lt.s32.totalorder %s1157_s22, %s1590_s13 }
  0x2d   : > { %650 = vmatpush.bf16.msrb.mxu0 %v1066_v33  ;;  %1070 = vmatpush.bf16.msrb.mxu1 %v1066_v33  ;;  %p1159_p12 = scmp.ne.s32.totalorder %s1157_s22, %s1158_s24  ;;  %p1164_p2 = scmp.lt.s32.totalorder %s1162_s21, %s1158_s24 }
  0x2e   : > { %v1139_v13 = vpop.eup %1138  ;;  %1072 = vmatpush.bf16.msra.mxu3 %v1066_v33 }
  0x2f   : > { %v1399_v15 = vperm.slane %v1139_v13, 1  ;;  %v1401_v17 = vperm.slane %v1139_v13, 0  ;;  %1071 = vmatpush.bf16.msrb.mxu2 %v1066_v33  ;;  %v694_v33 = vld [vmem:[%s1584_s7 + $0x10] sm:$0xff]  ;;  %p1160_p13 = pnand %p1159_p12, %p1348_p5  ;;  %p1165_p3 = por %p1164_p2, %p1163_p1 }
  0x31   : > { %770 = vperm.xlu1 %1121, %v1399_v15   ;;  %721 = vperm.xlu0 %1119, %v1401_v17   ;;  %p1161_p0 = pneg %p1160_p13 }
  0x32   : > { %733 = vperm.xlu2 %1123, %v1401_v17  }
  0x33   : > { %p1166_p4 = pnand %p1165_p3, %p1161_p0 }
  0x39   : > { %1122 = vset.pattern.permute.xlu1 %v725_v20  ;;  %1120 = vset.pattern.permute.xlu0 %v725_v20 }
  0x3a   : > { %782 = vperm.xlu2 %1123, %v1399_v15  }
  0x41   : > { %776 = vperm.xlu1 %1122, %v1399_v15   ;;  %727 = vperm.xlu0 %1120, %v1401_v17  }
  0x42   : > { %1125 = vset.pattern.permute.xlu2 %v737_v29 }
  0x49   : > { %1124 = vset.pattern.permute.xlu1 %v737_v29  ;;  %1126 = vset.pattern.permute.xlu0 %v743_v32 }
  0x4a   : > { %788 = vperm.xlu2 %1125, %v1399_v15  }
  0x51   : > { %739 = vperm.xlu1 %1124, %v1401_v17   ;;  %745 = vperm.xlu0 %1126, %v1401_v17  }
  0x52   : > { %1128 = vset.pattern.permute.xlu2 %v749_v34 }
  0x59   : > { %1127 = vset.pattern.permute.xlu1 %v743_v32  ;;  %1131 = vset.pattern.permute.xlu0 %v755_v63 }
  0x5a   : > { %751 = vperm.xlu2 %1128, %v1401_v17  }
  0x61   : > { %794 = vperm.xlu1 %1127, %v1399_v15   ;;  %806 = vperm.xlu0 %1131, %v1399_v15  }
  0x62   : > { %1130 = vset.pattern.permute.xlu2 %v755_v63 }
  0x69   : > { %1129 = vset.pattern.permute.xlu1 %v749_v34  ;;  %1134 = vset.pattern.permute.xlu0 %v761_v35 }
  0x6a   : > { %757 = vperm.xlu2 %1130, %v1401_v17  }
  0x71   : > { %800 = vperm.xlu1 %1129, %v1399_v15  }
  0x72   : > { %1133 = vset.pattern.permute.xlu2 %v761_v35 }
  0x79   : > { %1132 = vset.pattern.permute.xlu1 %v761_v35 }
  0x7a   : > { %812 = vperm.xlu2 %1133, %v1399_v15   ;;  %v693_v15 = vld [vmem:[%s1584_s7 + $0x8] sm:$0xff] }
  0x81   : > { %763 = vperm.xlu1 %1132, %v1401_v17  }
  0x8c   : > { %v734_v17 = vpop.permute.xlu2 %733 }
  0x94   : > { %v783_v20 = vpop.permute.xlu2 %782 }
  0xa3   : > { %v498_v25 = vpop.f32.mrf.mxu0  ;;  %v771_v16 = vpop.permute.xlu1 %770 }
  0xa4   : > { %v499_v26 = vadd.f32 %v1135_v22, %v498_v25  ;;  %v722_v21 = vpop.permute.xlu0 %721 }
  0xa6   : > { %v502_v28 = vmax.f32 %v499_v26, 0.0  ;;  %v789_v26 = vpop.permute.xlu2 %788 }
  0xa8   : > { %v503_v30 = vpack.c.bf16 %v502_v28, %v502_v28 }
  0xaa   : > { %1045 = vmatmul.msk.bf16.vlgmr.msra.gmra.mxu1 %vm516_vm5, %v503_v30  ;;  %v692_v30 = vld [vmem:[%s1584_s7] sm:$0xff] }
  0xab   : > { %v500_v31 = vpop.f32.mrf.mxu0 }
  0xad   : > { %v1465_v0 = vpop.f32.mrf.mxu2 }
  0xb3   : > { %v1474_v18 = vpop.permute.xlu1 %776  ;;  %v728_v27 = vpop.permute.xlu0 %727 }
  0xb5   : > { %v563_v5 = vpop.f32.mrf.mxu2 }
  0xb6   : > { %v699_v5 = vld [vmem:[%s1584_s7 + $0x38] sm:$0xff] }
  0xc3   : > { %v740_v22 = vpop.permute.xlu1 %739 }
  0xd3   : > { %v1479_v29 = vpop.permute.xlu1 %794 }
 0x127   : > { %v529_v37 = vpop.f32.mrf.mxu1 }
 0x128   : > { %v530_v38 = vadd.f32 %v1136_v36, %v529_v37 }
 0x12a   : > { %v574_v43 = vrot.slane %v530_v38, 1  ;;  %v575_v44 = vperm.slane %v530_v38, 0  ;;  %534 = vst.msk [vmem:[%s1374_s19] sm:$0x3] %vm533_vm6, %v530_v38 }
 0x12c   : > { %v576_v47 = vperm.slane %v574_v43, 0  ;;  %v579_v48 = vmul.f32 %v575_v44, %v565_v39  ;;  %v580_v49 = vmul.f32 %v575_v44, %v566_v40  ;;  %v583_v50 = vmul.f32 %v575_v44, %v569_v41  ;;  %v746_v43 = vpop.permute.xlu0 %745 }
 0x12d   : > { %v584_v51 = vmul.f32 %v575_v44, %v570_v42  ;;  %v585_v52 = vmul.f32 %v575_v44, %v571_v45  ;;  %v586_v53 = vmul.f32 %v575_v44, %v572_v46  ;;  %v581_v1 = vmul.f32 %v575_v44, %v567_v54 }
 0x12e   : > { %v595_v56 = vpack.c.bf16 %v580_v49, %v579_v48  ;;  %v589_v57 = vmul.f32 %v576_v47, %v567_v54  ;;  %v590_v58 = vmul.f32 %v576_v47, %v568_v55  ;;  %v582_v2 = vmul.f32 %v575_v44, %v568_v55  ;;  %v801_v48 = vpop.permute.xlu1 %800 }
 0x12f   : > { %v531_v59 = vpop.f32.mrf.mxu1  ;;  %v597_v60 = vpack.c.bf16 %v584_v51, %v583_v50  ;;  %v598_v61 = vpack.c.bf16 %v586_v53, %v585_v52  ;;  %v587_v3 = vmul.f32 %v576_v47, %v565_v39  ;;  %v588_v4 = vmul.f32 %v576_v47, %v566_v40  ;;  %v696_v39 = vld [vmem:[%s1584_s7 + $0x20] sm:$0xff]  ;;  %v752_v40 = vpop.permute.xlu2 %751  ;;  %v695_v50 = vld [vmem:[%s1584_s7 + $0x18] sm:$0xff] }
 0x130   : > { %1051 = vmatmul.msk.bf16.vlgmr.msrb.gmra.mxu0 %vm615_vm7, %v595_v56  ;;  %v600_v62 = vpack.c.bf16 %v590_v58, %v589_v57  ;;  %v591_v6 = vmul.f32 %v576_v47, %v569_v41  ;;  %v592_v9 = vmul.f32 %v576_v47, %v570_v42  ;;  %v596_v10 = vpack.c.bf16 %v582_v2, %v581_v1  ;;  %v698_v57 = vld [vmem:[%s1584_s7 + $0x30] sm:$0xff] }
 0x131   : > { %1053 = vmatmul.msk.bf16.vlgmr.msrb.gmra.mxu1 %vm615_vm7, %v597_v60  ;;  %1054 = vmatmul.msk.bf16.vlgmr.msrb.gmra.mxu2 %vm615_vm7, %v598_v61  ;;  %v599_v11 = vpack.c.bf16 %v588_v4, %v587_v3  ;;  %v593_v12 = vmul.f32 %v576_v47, %v571_v45  ;;  %v594_v13 = vmul.f32 %v576_v47, %v572_v46  ;;  %v697_v45 = vld [vmem:[%s1584_s7 + $0x28] sm:$0xff] }
 0x132   : > { %1056 = vmatmul.msk.bf16.vlgmr.msra.gmra.mxu3 %vm615_vm7, %v600_v62  ;;  %v601_v8 = vpack.c.bf16 %v592_v9, %v591_v6 }
 0x133   : > { %v602_v14 = vpack.c.bf16 %v594_v13, %v593_v12 }
 0x137   : > { %v758_v4 = vpop.permute.xlu2 %757 }
 0x140   : > { %1052 = vmatmul.msk.bf16.gmra.mxu0 %vm615_vm7, %v596_v10 }
 0x141   : > { %1055 = vmatmul.msk.bf16.gmra.mxu2 %vm615_vm7, %v599_v11 }
 0x142   : > { %1057 = vmatmul.msk.bf16.gmra.mxu3 %vm615_vm7, %v601_v8 }
 0x152   : > { %1058 = vmatmul.msk.bf16.gmra.mxu3 %vm615_vm7, %v602_v14 }
 0x1ad   : > { %v652_v19 = vpop.f32.mrf.mxu0 }
 0x1ae   : > { %v662_v28 = vpop.f32.mrf.mxu1  ;;  %v700_v36 = vmul.f32 %v692_v30, %v652_v19 }
 0x1af   : > { %v704_v46 = vmul.f32 %v696_v39, %v662_v28 }
 0x1b0   : > { %v814_v41 = vmul.f32 %v722_v21, %v700_v36 }
 0x1b1   : > { %v818_v59 = vmul.f32 %v746_v43, %v704_v46 }
 0x1b2   : > { %v831_v53 = vsel %vm830_vm8, %v814_v41, 0.0  ;;  %v807_v41 = vpop.permute.xlu0 %806 }
 0x1b3   : > { %v838_v9 = vsel %vm830_vm8, %v818_v59, 0.0 }
 0x1b4   : > { %v667_v23 = vpop.f32.mrf.mxu2 }
 0x1b5   : > { %v654_v24 = vpop.f32.mrf.mxu0  ;;  %v677_v25 = vpop.f32.mrf.mxu3  ;;  %v706_v63 = vmul.f32 %v698_v57, %v667_v23 }
 0x1b6   : > { %v701_v31 = vmul.f32 %v693_v15, %v654_v24  ;;  %v664_v44 = vpop.f32.mrf.mxu1  ;;  %v710_v3 = vmul.f32 %v694_v33, %v677_v25  ;;  %v764_v23 = vpop.permute.xlu1 %763 }
 0x1b7   : > { %v705_v54 = vmul.f32 %v697_v45, %v664_v44  ;;  %v820_v19 = vmul.f32 %v758_v4, %v706_v63 }
 0x1b8   : > { %v815_v38 = vmul.f32 %v728_v27, %v701_v31 }
 0x1b9   : > { %v819_v1 = vmul.f32 %v752_v40, %v705_v54 }
 0x1ba   : > { %v832_v47 = vsel %vm830_vm8, %v815_v38, 0.0 }
 0x1bb   : > { %v833_v58 = vadd.f32 %v832_v47, %v831_v53 }
 0x1bc   : > { %v669_v32 = vpop.f32.mrf.mxu2 }
 0x1bd   : > { %v657_v34 = vpop.f32.mrf.mxu0  ;;  %v679_v35 = vpop.f32.mrf.mxu3  ;;  %v707_v21 = vmul.f32 %v699_v5, %v669_v32 }
 0x1be   : > { %v702_v37 = vmul.f32 %v694_v33, %v657_v34  ;;  %v711_v11 = vmul.f32 %v695_v50, %v679_v35 }
 0x1bf   : > { %v821_v33 = vmul.f32 %v764_v23, %v707_v21 }
 0x1c0   : > { %v816_v42 = vmul.f32 %v734_v17, %v702_v37  ;;  %v840_v17 = vsel %vm830_vm8, %v819_v1, 0.0  ;;  %v825_v28 = vmul.f32 %v789_v26, %v711_v11 }
 0x1c1   : > { %v844_v26 = vsel %vm830_vm8, %v821_v33, 0.0 }
 0x1c2   : > { %v834_v55 = vsel %vm830_vm8, %v816_v42, 0.0  ;;  %v857_v37 = vsel %vm830_vm8, %v825_v28, 0.0 }
 0x1c3   : > { %v835_v61 = vadd.f32 %v834_v55, %v833_v58 }
 0x1c4   : > { %v672_v49 = vpop.f32.mrf.mxu2 }
 0x1c5   : > { %v659_v51 = vpop.f32.mrf.mxu0  ;;  %v682_v52 = vpop.f32.mrf.mxu3  ;;  %v708_v62 = vmul.f32 %v692_v30, %v672_v49 }
 0x1c6   : > { %v703_v56 = vmul.f32 %v695_v50, %v659_v51  ;;  %v712_v27 = vmul.f32 %v696_v39, %v682_v52 }
 0x1c7   : > { %v822_v8 = vmul.f32 %v771_v16, %v708_v62  ;;  %v842_v16 = vsel %vm830_vm8, %v820_v19, 0.0 }
 0x1c8   : > { %v817_v60 = vmul.f32 %v740_v22, %v703_v56  ;;  %v824_v22 = vmul.f32 %v783_v20, %v710_v3  ;;  %v826_v32 = vmul.f32 %v1479_v29, %v712_v27  ;;  %v873_v3 = vsub.f32 0.0, %v1387_v7 }
 0x1c9   : > { %v852_v30 = vsel %vm830_vm8, %v822_v8, 0.0 }
 0x1ca   : > { %v836_v2 = vsel %vm830_vm8, %v817_v60, 0.0  ;;  %v855_v34 = vsel %vm830_vm8, %v824_v22, 0.0  ;;  %v859_v42 = vsel %vm830_vm8, %v826_v32, 0.0 }
 0x1cb   : > { %v837_v6 = vadd.f32 %v836_v2, %v835_v61  ;;  %v1137_v2 = vld [vmem:[%s1588_s11] ss:$0 sm:$0xff] }
 0x1cc   : > { %v674_v10 = vpop.f32.mrf.mxu2 }
 0x1cd   : > { %v839_v12 = vadd.f32 %v838_v9, %v837_v6  ;;  %v709_v13 = vmul.f32 %v693_v15, %v674_v10  ;;  %v684_v14 = vpop.f32.mrf.mxu3  ;;  %v562_v9 = vadd.f32 %v1137_v2, %v1465_v0 }
 0x1ce   : > { %v713_v36 = vmul.f32 %v697_v45, %v684_v14  ;;  %v813_v45 = vpop.permute.xlu2 %812 }
 0x1cf   : > { %v841_v24 = vadd.f32 %v840_v17, %v839_v12  ;;  %v823_v25 = vmul.f32 %v1474_v18, %v709_v13 }
 0x1d0   : > { %v827_v43 = vmul.f32 %v801_v48, %v713_v36 }
 0x1d1   : > { %v853_v31 = vsel %vm830_vm8, %v823_v25, 0.0  ;;  %v843_v35 = vadd.f32 %v842_v16, %v841_v24 }
 0x1d2   : > { %v854_v15 = vadd.f32 %v853_v31, %v852_v30  ;;  %v861_v49 = vsel %vm830_vm8, %v827_v43, 0.0 }
 0x1d3   : > { %v845_v40 = vadd.f32 %v844_v26, %v843_v35 }
 0x1d4   : > { %v856_v20 = vadd.f32 %v855_v34, %v854_v15 }
 0x1d5   : > { %v687_v18 = vpop.f32.mrf.mxu3  ;;  %v846_v47 = vrot.slane %v845_v40, 4 }
 0x1d6   : > { %v714_v38 = vmul.f32 %v698_v57, %v687_v18  ;;  %v858_v39 = vadd.f32 %v857_v37, %v856_v20 }
 0x1d7   : > { %v847_v53 = vadd.f32 %v846_v47, %v845_v40 }
 0x1d8   : > { %v860_v44 = vadd.f32 %v859_v42, %v858_v39  ;;  %v828_v46 = vmul.f32 %v807_v41, %v714_v38 }
 0x1d9   : > { %v848_v57 = vrot.slane %v847_v53, 2 }
 0x1da   : > { %v862_v29 = vadd.f32 %v861_v49, %v860_v44  ;;  %v863_v51 = vsel %vm830_vm8, %v828_v46, 0.0 }
 0x1db   : > { %v849_v48 = vadd.f32 %v848_v57, %v847_v53 }
 0x1dc   : > { %v864_v55 = vadd.f32 %v863_v51, %v862_v29 }
 0x1dd   : > { %v689_v50 = vpop.f32.mrf.mxu3  ;;  %v850_v62 = vrot.slane %v849_v48, 1 }
 0x1de   : > { %v715_v52 = vmul.f32 %v699_v5, %v689_v50 }
 0x1df   : > { %v851_v4 = vadd.f32 %v850_v62, %v849_v48 }
 0x1e0   : > { %v829_v54 = vmul.f32 %v813_v45, %v715_v52 }
 0x1e2   : > { %v865_v56 = vsel %vm830_vm8, %v829_v54, 0.0 }
 0x1e3   : > { %v866_v58 = vadd.f32 %v865_v56, %v864_v55 }
 0x1e5   : > { %v867_v59 = vrot.slane %v866_v58, 4 }
 0x1e7   : > { %v868_v60 = vadd.f32 %v867_v59, %v866_v58 }
 0x1e9   : > { %v869_v61 = vrot.slane %v868_v60, 2 }
 0x1eb   : > { %v870_v63 = vadd.f32 %v869_v61, %v868_v60 }
 0x1ed   : > { %v871_v1 = vrot.slane %v870_v63, 1 }
 0x1ef   : > { %v872_v5 = vadd.f32 %v871_v1, %v870_v63 }
 0x1f1   : > { %v877_v6 = vsel %vm876_vm9, %v872_v5, %v851_v4 }
 0x1f2   : > { %v879_v10 = vadd.f32 %v877_v6, %v873_v3 }
 0x1f4   : > { %v880_v11 = vadd.f32 %v879_v10, %v562_v9 }
 0x1f6   : > { %v881_v8 = vmul.f32 0.33333334, %v880_v11 }
 0x1f8   : > { %v882_v12 = vadd.f32 %v881_v8, %v1387_v7 }
 0x1f9   : > { %1169 = shalt.err (!%p1166_p4)
}
 0x1fa   : > { %1074 = dma.vmem_to_hbm [thread:$0]  (%p1348_p5), %s925_s15, 32, %s927_s16, %s898_s27   ;;  %884 = vst.msk [vmem:[#allocation2] sm:$0x3] %vm883_vm10, %v882_v12  ;;  %1140 = vtanh.f32 %v882_v12 }
 0x1fb   : > { %s1239_s23 = smov 64   ;;  %s908_s22 = scalar_lea.hbm %s1589_s12, %s1061_s25 }
 0x1fc   : > { %s910_s24 = sshll.u32 %s1372_s14, 4  ;;  %s912_s17 = sshll.u32 %s908_s22, 4  ;;  %s911_s24 = int_to_ptr.vmem [resolvable:$true] %s910_s24  ;;  %s913_s17 = int_to_ptr.hbm [resolvable:$true] %s912_s17 }
 0x1fd   : > { %s893_s15 = scalar_lea.sflag [#allocation4], %s1359_s20  ;;  %s1184_s16 = sshra.s32 %s913_s17, 4  ;;  %s1185_s16 = int_to_ptr.hbm [resolvable:$true] %s1184_s16 }
 0x1fe   : > { %s1186_s27 = scalar_lea.hbm %s1185_s16, 2  ;;  %s1190_s25 = scalar_lea.hbm %s1589_s12, 16 }
 0x1ff   : > { %p1187_p7 = scmp.ne.s32.totalorder %s1185_s16, %s1186_s27  ;;  %p1191_p10 = scmp.lt.s32.totalorder %s1185_s16, %s1589_s12 }
 0x200   : > { %v1141_v7 = vpop.eup %1140  ;;  %p1192_p11 = scmp.lt.s32.totalorder %s1190_s25, %s1186_s27 }
 0x201   : > { %887 = vrot.lane.b32.xlu1 %v1141_v7, %s1239_s23  ;;  %p1188_p8 = pnand %p1187_p7, %p1348_p5 }
 0x202   : > { %p1193_p12 = por %p1192_p11, %p1191_p10 }
 0x203   : > { %p1189_p9 = pneg %p1188_p8 }
 0x205   : > { %p1194_p13 = pnand %p1193_p12, %p1189_p9 }
 0x273   : > { %v888_v0 = vpop.permute.xlu1 %887 }
 0x274   : > { %v890_v13 = vsel %vm830_vm8, %v882_v12, %v888_v0 }
 0x275   : > { %891 = vst [vmem:[%s1372_s14] sm:$0x3] %v890_v13 }
 0x276   : > { %1197 = shalt.err (!%p1194_p13)
}
 0x277   : > { %1073 = dma.vmem_to_hbm [thread:$0]  (%p1348_p5), %s911_s24, 32, %s913_s17, %s893_s15  }
 0x278 PF: > { %s1605_s14 = sld [smem:[#allocation9_spill]]  ;;  %p1084_p0 = scmp.ge.s32.totalorder %s1236_s28, 2 }
 0x27a   : > { %p1078_p1 = pnand %p1084_p0, %p1352_p6 }
 0x27c   : > { %p1079_p2 = pneg %p1078_p1 }
 0x27e   : > { %s938_s30 = sand.u32 1, %s1605_s14  }
 0x27f   : > { %s939_s29 = scalar_lea.sflag [#allocation4], %s938_s30 }
 0x280   : > { %1215 = dma.done.wait (%p1079_p2), %s939_s29, 32  }
 0x281   : > { %1217 = vsyncadd (%p1079_p2), %s939_s29, 4294967264  ;;  %s949_s22 = scalar_lea.sflag [#allocation6], %s938_s30 }
 0x282   : > { %1219 = dma.done.wait (%p1079_p2), %s949_s22, 32  }
 0x283   : > { %1221 = vsyncadd (%p1079_p2), %s949_s22, 4294967264  ;;  %s1607_s28 = sld [smem:[#allocation12_spill]] }
 0x284   : > { %s1608_s25 = sld [smem:[#allocation10_spill]] }
 0x285   : > { %s1609_s26 = sld [smem:[#allocation11_spill]] }
 0x286   : > { %s1610_s27 = sld [smem:[#allocation13_spill]] }
 0x289   : > { %p27_p5 = scmp.ge.s32.totalorder %s1607_s28, 10  }
 0x28b   :  { %29 = sbr.rel (!%p27_p5) target bundleno = 5 (0x5), region = 127 }
 0x290   :  { %955 = vsyncpa [#allocation4], 1 }
 0x291   :  { %957 = vsyncpa [#allocation4 + $0x1], 1 }
 0x292   :  { %958 = vsyncpa [#allocation6], 1 }
 0x293   :  { %960 = vsyncpa [#allocation6 + $0x1], 1 }

</bundles_post_ra>
